<compile_context>
chip_gen: v7x
topology: tpu7x:2x2x1
jax: 0.10.0
libtpu: 0.0.40
codegen_flags: <defaults>
</compile_context>

<pallas_src>
import jax
import jax.numpy as jnp
from jax.experimental import pallas as pl
from jax.experimental.pallas import tpu as pltpu

IN_FEATURES = 784
HIDDEN = 64
N_OUT = 10


def _round_up(n, m):
    return ((n + m - 1) // m) * m


def _mlp_kernel(x_ref, w1_ref, b1_ref, w2_ref, b2_ref, w3_ref, b3_ref,
                w4_ref, b4_ref, o_ref):
    # x arrives in its HBM dtype (f32 here); cast to bf16 only for the fc1
    # MXU matmul (VPU cast, hidden under the x-tile DMA).
    x = x_ref[...].astype(jnp.bfloat16)

    # fc1 + relu  (bf16 operands, f32 accumulate)
    h = jnp.dot(x, w1_ref[...], preferred_element_type=jnp.float32) + b1_ref[...]
    h = jnp.maximum(h, 0.0)
    # fc2 + relu  (h stays f32 between layers; MXU has huge slack here)
    h = jnp.dot(h, w2_ref[...], preferred_element_type=jnp.float32) + b2_ref[...]
    h = jnp.maximum(h, 0.0)
    # fc3 + relu
    h = jnp.dot(h, w3_ref[...], preferred_element_type=jnp.float32) + b3_ref[...]
    h = jnp.maximum(h, 0.0)
    # fc4 (no relu)
    logits = jnp.dot(h, w4_ref[...], preferred_element_type=jnp.float32) + b4_ref[...]

    # softmax over classes (exact divide: kernel is memory-bound, divide is free)
    m = jnp.max(logits, axis=1, keepdims=True)
    e = jnp.exp(logits - m)
    denom = jnp.sum(e, axis=1, keepdims=True)
    o_ref[...] = (e / denom).astype(o_ref.dtype)


def _core_semantics():
    """(dimension_semantics tuple, number of TensorCores to target)."""
    try:
        kind = jax.devices()[0].device_kind.lower()
    except Exception:
        kind = ""
    multi_tc = ("v7" in kind) or ("7x" in kind)
    if multi_tc and hasattr(pltpu, "CORE_PARALLEL"):
        return (pltpu.CORE_PARALLEL,), 2
    return ("parallel",), 1


def _choose_tm(tm, batch, n_cores):
    """Pick the batch tile: big (amortize per-step cost), multiple of 8 when
    the grid is >1 tile, split evenly across TensorCores on multi-TC chips."""
    tm = max(8, _round_up(min(tm, 4096), 8))
    if n_cores > 1 and batch > 8 * n_cores:
        # make sure every core gets at least one tile (e.g. B=2048 -> TM<=1024)
        tm = min(tm, _round_up(pl.cdiv(batch, n_cores), 8))
    if tm >= batch:
        return batch  # single block == full array (always layout-legal)
    return tm


def _vmem_limit_bytes(tm, x_itemsize):
    """Actual footprint + headroom (do NOT request all physical VMEM on v7x)."""
    x_tiles = 2 * tm * IN_FEATURES * x_itemsize            # double-buffered x
    out_tiles = 2 * tm * N_OUT * 4                         # double-buffered out
    weights = 2 * (IN_FEATURES * HIDDEN * 2                # w1 bf16
                   + 2 * HIDDEN * HIDDEN * 4               # w2, w3 f32
                   + HIDDEN * N_OUT * 4                    # w4 f32
                   + (3 * HIDDEN + N_OUT) * 4)             # biases f32
    acts = tm * (IN_FEATURES * 2 + 6 * HIDDEN * 4 + 4 * 128 * 4)  # in-kernel temps
    budget = x_tiles + out_tiles + weights + acts + (8 << 20)
    return int(min(max(budget, 16 << 20), 56 << 20))


def net_forward(x, params, *, tm=1024):
    """x: (B, 784) float array (f32 or bf16). params: dict of weights/biases."""
    B, F = x.shape
    assert F == IN_FEATURES
    semantics, n_cores = _core_semantics()
    tm = _choose_tm(tm, B, n_cores)
    grid = (pl.cdiv(B, tm),)   # ragged last tile; OOB rows' writes are dropped

    const = lambda i: (0, 0)   # weights/biases: VMEM resident, DMA'd once
    out = pl.pallas_call(
        _mlp_kernel,
        out_shape=jax.ShapeDtypeStruct((B, N_OUT), jnp.float32),
        grid=grid,
        in_specs=[
            pl.BlockSpec((tm, IN_FEATURES), lambda i: (i, 0)),   # x: batch-tiled
            pl.BlockSpec((IN_FEATURES, HIDDEN), const),
            pl.BlockSpec((1, HIDDEN), const),
            pl.BlockSpec((HIDDEN, HIDDEN), const),
            pl.BlockSpec((1, HIDDEN), const),
            pl.BlockSpec((HIDDEN, HIDDEN), const),
            pl.BlockSpec((1, HIDDEN), const),
            pl.BlockSpec((HIDDEN, N_OUT), const),
            pl.BlockSpec((1, N_OUT), const),
        ],
        out_specs=pl.BlockSpec((tm, N_OUT), lambda i: (i, 0)),
        compiler_params=pltpu.CompilerParams(
            dimension_semantics=semantics,
            vmem_limit_bytes=_vmem_limit_bytes(tm, x.dtype.itemsize),
        ),
    )(x, params["w1"], params["b1"], params["w2"], params["b2"],
      params["w3"], params["b3"], params["w4"], params["b4"])
    return out


def init_params(key):
    """Deterministic init matching nn.Linear shapes.

    Weights are stored transposed as (in, out). w1 is bf16 (fc1 matmul
    operand); w2..w4 and all biases stay f32.
    """
    dims = [(IN_FEATURES, HIDDEN), (HIDDEN, HIDDEN), (HIDDEN, HIDDEN),
            (HIDDEN, N_OUT)]
    params = {}
    for i, (fan_in, fan_out) in enumerate(dims, start=1):
        key, wk, bk = jax.random.split(key, 3)
        bound = 1.0 / jnp.sqrt(fan_in)
        w = jax.random.uniform(wk, (fan_in, fan_out), jnp.float32, -bound, bound)
        params[f"w{i}"] = w.astype(jnp.bfloat16) if i == 1 else w
        params[f"b{i}"] = jax.random.uniform(
            bk, (1, fan_out), jnp.float32, -bound, bound)
    return params


def _reference(x, params):
    """Pure-JAX f32 reference of the PyTorch forward."""
    h = x.astype(jnp.float32)
    for i in range(1, 4):
        h = jnp.maximum(
            h @ params[f"w{i}"].astype(jnp.float32) + params[f"b{i}"], 0.0)
    logits = h @ params["w4"].astype(jnp.float32) + params["b4"]
    return jax.nn.softmax(logits, axis=1)


if __name__ == "__main__":
    key = jax.random.PRNGKey(0)
    pkey, xkey1, xkey2 = jax.random.split(key, 3)
    params = init_params(pkey)

    # Small batch: single full-array block.
    x_small = jax.random.normal(xkey1, (8, IN_FEATURES), jnp.float32)
    out_small = jax.block_until_ready(net_forward(x_small, params))
    assert out_small.shape == (8, N_OUT)
    assert jnp.allclose(jnp.sum(out_small, axis=1), 1.0, atol=1e-4)
    assert jnp.allclose(out_small, _reference(x_small, params), atol=2e-2)

    # Ragged batch: grid of 2 tiles with a partial tail (no padding pass).
    x_big = jax.random.normal(xkey2, (200, IN_FEATURES), jnp.float32)
    out_big = jax.block_until_ready(net_forward(x_big, params, tm=128))
    assert out_big.shape == (200, N_OUT)
    assert jnp.allclose(jnp.sum(out_big, axis=1), 1.0, atol=1e-4)
    assert jnp.allclose(out_big, _reference(x_big, params), atol=2e-2)

    print("KERNEL_OK")
</pallas_src>

<mosaic_0001>
module attributes {stable_mosaic.version = 11 : i64} {
  func.func @_mlp_kernel(%arg0: i32, %arg1: memref<8x784xf32, #tpu.memory_space<vmem>>, %arg2: memref<784x64xbf16, #tpu.memory_space<vmem>>, %arg3: memref<1x64xf32, #tpu.memory_space<vmem>>, %arg4: memref<64x64xf32, #tpu.memory_space<vmem>>, %arg5: memref<1x64xf32, #tpu.memory_space<vmem>>, %arg6: memref<64x64xf32, #tpu.memory_space<vmem>>, %arg7: memref<1x64xf32, #tpu.memory_space<vmem>>, %arg8: memref<64x10xf32, #tpu.memory_space<vmem>>, %arg9: memref<1x10xf32, #tpu.memory_space<vmem>>, %arg10: memref<8x10xf32, #tpu.memory_space<vmem>>) attributes {dimension_semantics = [#tpu.dimension_semantics<parallel>], iteration_bounds = array<i64: 1>, scalar_prefetch = 0 : i64, scratch_operands = 0 : i64, tpu.core_type = #tpu.core_type<tc>, window_params = [{transform_indices = @transform_0, window_bounds = array<i64: 8, 784>}, {pipeline_mode = #tpu.pipeline_mode<synchronous>, transform_indices = @transform_1, window_bounds = array<i64: 784, 64>}, {pipeline_mode = #tpu.pipeline_mode<synchronous>, transform_indices = @transform_2, window_bounds = array<i64: 1, 64>}, {pipeline_mode = #tpu.pipeline_mode<synchronous>, transform_indices = @transform_3, window_bounds = array<i64: 64, 64>}, {pipeline_mode = #tpu.pipeline_mode<synchronous>, transform_indices = @transform_4, window_bounds = array<i64: 1, 64>}, {pipeline_mode = #tpu.pipeline_mode<synchronous>, transform_indices = @transform_5, window_bounds = array<i64: 64, 64>}, {pipeline_mode = #tpu.pipeline_mode<synchronous>, transform_indices = @transform_6, window_bounds = array<i64: 1, 64>}, {pipeline_mode = #tpu.pipeline_mode<synchronous>, transform_indices = @transform_7, window_bounds = array<i64: 64, 10>}, {pipeline_mode = #tpu.pipeline_mode<synchronous>, transform_indices = @transform_8, window_bounds = array<i64: 1, 10>}, {transform_indices = @transform_9, window_bounds = array<i64: 8, 10>}]} {
    %c0 = arith.constant 0 : index
    %c0_0 = arith.constant 0 : index
    %0 = vector.load %arg1[%c0, %c0_0] : memref<8x784xf32, #tpu.memory_space<vmem>>, vector<8x784xf32>
    %1 = arith.truncf %0 : vector<8x784xf32> to vector<8x784xbf16>
    %c0_1 = arith.constant 0 : index
    %c0_2 = arith.constant 0 : index
    %2 = vector.load %arg2[%c0_1, %c0_2] : memref<784x64xbf16, #tpu.memory_space<vmem>>, vector<784x64xbf16>
    %cst = arith.constant dense<0.000000e+00> : vector<8x64xf32>
    %3 = tpu.matmul %1, %2, %cst {dimension_numbers = #tpu.dot_dimension_numbers<[1], [0], [0], [1], [0, 0, 1, 1], [], []>} : vector<8x784xbf16>, vector<784x64xbf16>, vector<8x64xf32> -> vector<8x64xf32>
    %c0_3 = arith.constant 0 : index
    %c0_4 = arith.constant 0 : index
    %4 = vector.load %arg3[%c0_3, %c0_4] : memref<1x64xf32, #tpu.memory_space<vmem>>, vector<1x64xf32>
    %5 = vector.broadcast %4 : vector<1x64xf32> to vector<8x64xf32>
    %6 = arith.addf %3, %5 : vector<8x64xf32>
    %cst_5 = arith.constant 0.000000e+00 : f32
    %7 = vector.broadcast %cst_5 : f32 to vector<8x64xf32>
    %8 = arith.maximumf %6, %7 : vector<8x64xf32>
    %c0_6 = arith.constant 0 : index
    %c0_7 = arith.constant 0 : index
    %9 = vector.load %arg4[%c0_6, %c0_7] : memref<64x64xf32, #tpu.memory_space<vmem>>, vector<64x64xf32>
    %cst_8 = arith.constant dense<0.000000e+00> : vector<8x64xf32>
    %10 = tpu.matmul %8, %9, %cst_8 {dimension_numbers = #tpu.dot_dimension_numbers<[1], [0], [0], [1], [0, 0, 1, 1], [], []>} : vector<8x64xf32>, vector<64x64xf32>, vector<8x64xf32> -> vector<8x64xf32>
    %c0_9 = arith.constant 0 : index
    %c0_10 = arith.constant 0 : index
    %11 = vector.load %arg5[%c0_9, %c0_10] : memref<1x64xf32, #tpu.memory_space<vmem>>, vector<1x64xf32>
    %12 = vector.broadcast %11 : vector<1x64xf32> to vector<8x64xf32>
    %13 = arith.addf %10, %12 : vector<8x64xf32>
    %cst_11 = arith.constant 0.000000e+00 : f32
    %14 = vector.broadcast %cst_11 : f32 to vector<8x64xf32>
    %15 = arith.maximumf %13, %14 : vector<8x64xf32>
    %c0_12 = arith.constant 0 : index
    %c0_13 = arith.constant 0 : index
    %16 = vector.load %arg6[%c0_12, %c0_13] : memref<64x64xf32, #tpu.memory_space<vmem>>, vector<64x64xf32>
    %cst_14 = arith.constant dense<0.000000e+00> : vector<8x64xf32>
    %17 = tpu.matmul %15, %16, %cst_14 {dimension_numbers = #tpu.dot_dimension_numbers<[1], [0], [0], [1], [0, 0, 1, 1], [], []>} : vector<8x64xf32>, vector<64x64xf32>, vector<8x64xf32> -> vector<8x64xf32>
    %c0_15 = arith.constant 0 : index
    %c0_16 = arith.constant 0 : index
    %18 = vector.load %arg7[%c0_15, %c0_16] : memref<1x64xf32, #tpu.memory_space<vmem>>, vector<1x64xf32>
    %19 = vector.broadcast %18 : vector<1x64xf32> to vector<8x64xf32>
    %20 = arith.addf %17, %19 : vector<8x64xf32>
    %cst_17 = arith.constant 0.000000e+00 : f32
    %21 = vector.broadcast %cst_17 : f32 to vector<8x64xf32>
    %22 = arith.maximumf %20, %21 : vector<8x64xf32>
    %c0_18 = arith.constant 0 : index
    %c0_19 = arith.constant 0 : index
    %23 = vector.load %arg8[%c0_18, %c0_19] : memref<64x10xf32, #tpu.memory_space<vmem>>, vector<64x10xf32>
    %cst_20 = arith.constant dense<0.000000e+00> : vector<8x10xf32>
    %24 = tpu.matmul %22, %23, %cst_20 {dimension_numbers = #tpu.dot_dimension_numbers<[1], [0], [0], [1], [0, 0, 1, 1], [], []>} : vector<8x64xf32>, vector<64x10xf32>, vector<8x10xf32> -> vector<8x10xf32>
    %c0_21 = arith.constant 0 : index
    %c0_22 = arith.constant 0 : index
    %25 = vector.load %arg9[%c0_21, %c0_22] : memref<1x10xf32, #tpu.memory_space<vmem>>, vector<1x10xf32>
    %26 = vector.broadcast %25 : vector<1x10xf32> to vector<8x10xf32>
    %27 = arith.addf %24, %26 : vector<8x10xf32>
    %cst_23 = arith.constant dense<0xFF800000> : vector<8xf32>
    %28 = vector.multi_reduction <maximumf>, %27, %cst_23 [1] : vector<8x10xf32> to vector<8xf32>
    %29 = vector.shape_cast %28 : vector<8xf32> to vector<8x1xf32>
    %30 = vector.broadcast %29 : vector<8x1xf32> to vector<8x10xf32>
    %31 = arith.subf %27, %30 : vector<8x10xf32>
    %32 = math.exp %31 : vector<8x10xf32>
    %cst_24 = arith.constant dense<0.000000e+00> : vector<8xf32>
    %33 = vector.multi_reduction <add>, %32, %cst_24 [1] : vector<8x10xf32> to vector<8xf32>
    %34 = vector.shape_cast %33 : vector<8xf32> to vector<8x1xf32>
    %35 = vector.broadcast %34 : vector<8x1xf32> to vector<8x10xf32>
    %36 = arith.divf %32, %35 : vector<8x10xf32>
    %c0_25 = arith.constant 0 : index
    %c0_26 = arith.constant 0 : index
    %37 = vector.load %arg10[%c0_25, %c0_26] : memref<8x10xf32, #tpu.memory_space<vmem>>, vector<8x10xf32>
    tpu.vector_store %arg10[%c0_25, %c0_26], %36 {strides = array<i32>} : memref<8x10xf32, #tpu.memory_space<vmem>>, vector<8x10xf32>,
    return
  }
  func.func @transform_0(%arg0: i32) -> (i32, i32) {
    %c0_i32 = arith.constant 0 : i32
    %c0_i32_0 = arith.constant 0 : i32
    return %arg0, %c0_i32 : i32, i32
  }
  func.func @transform_1(%arg0: i32) -> (i32, i32) {
    %c0_i32 = arith.constant 0 : i32
    %c0_i32_0 = arith.constant 0 : i32
    %c0_i32_1 = arith.constant 0 : i32
    return %c0_i32, %c0_i32_0 : i32, i32
  }
  func.func @transform_2(%arg0: i32) -> (i32, i32) {
    %c0_i32 = arith.constant 0 : i32
    %c0_i32_0 = arith.constant 0 : i32
    %c0_i32_1 = arith.constant 0 : i32
    return %c0_i32, %c0_i32_0 : i32, i32
  }
  func.func @transform_3(%arg0: i32) -> (i32, i32) {
    %c0_i32 = arith.constant 0 : i32
    %c0_i32_0 = arith.constant 0 : i32
    %c0_i32_1 = arith.constant 0 : i32
    return %c0_i32, %c0_i32_0 : i32, i32
  }
  func.func @transform_4(%arg0: i32) -> (i32, i32) {
    %c0_i32 = arith.constant 0 : i32
    %c0_i32_0 = arith.constant 0 : i32
    %c0_i32_1 = arith.constant 0 : i32
    return %c0_i32, %c0_i32_0 : i32, i32
  }
  func.func @transform_5(%arg0: i32) -> (i32, i32) {
    %c0_i32 = arith.constant 0 : i32
    %c0_i32_0 = arith.constant 0 : i32
    %c0_i32_1 = arith.constant 0 : i32
    return %c0_i32, %c0_i32_0 : i32, i32
  }
  func.func @transform_6(%arg0: i32) -> (i32, i32) {
    %c0_i32 = arith.constant 0 : i32
    %c0_i32_0 = arith.constant 0 : i32
    %c0_i32_1 = arith.constant 0 : i32
    return %c0_i32, %c0_i32_0 : i32, i32
  }
  func.func @transform_7(%arg0: i32) -> (i32, i32) {
    %c0_i32 = arith.constant 0 : i32
    %c0_i32_0 = arith.constant 0 : i32
    %c0_i32_1 = arith.constant 0 : i32
    return %c0_i32, %c0_i32_0 : i32, i32
  }
  func.func @transform_8(%arg0: i32) -> (i32, i32) {
    %c0_i32 = arith.constant 0 : i32
    %c0_i32_0 = arith.constant 0 : i32
    %c0_i32_1 = arith.constant 0 : i32
    return %c0_i32, %c0_i32_0 : i32, i32
  }
  func.func @transform_9(%arg0: i32) -> (i32, i32) {
    %c0_i32 = arith.constant 0 : i32
    %c0_i32_0 = arith.constant 0 : i32
    return %arg0, %c0_i32 : i32, i32
  }
}

</mosaic_0001>

<bundles_post_ra>
// kernel: tpu_custom_call.1
= control target key start
LH: loop header
LB: loop body
LE: loop exit
PB: predicated region body
PF: predicated region fallthrough
CT: control target
= control target key end

     0   :  { %v1238_v44 = vmov 0.0   ;;  %vm1239_vm0 = vmmov 0   ;;  %s1583_s0 = inlined_call_operand.vmem [shape: f32[8,784], index: 0, kind: input, shape index: {}]   ;;  %s1584_s1 = inlined_call_operand.vmem [shape: bf16[784,64], index: 1, kind: input, shape index: {}]   ;;  %s1585_s2 = inlined_call_operand.vmem [shape: f32[1,64], index: 2, kind: input, shape index: {}]   ;;  %s1586_s3 = inlined_call_operand.vmem [shape: f32[64,64], index: 3, kind: input, shape index: {}]   ;;  %s1587_s4 = inlined_call_operand.vmem [shape: f32[1,64], index: 4, kind: input, shape index: {}]   ;;  %s1588_s5 = inlined_call_operand.vmem [shape: f32[64,64], index: 5, kind: input, shape index: {}]   ;;  %s1589_s6 = inlined_call_operand.vmem [shape: f32[1,64], index: 6, kind: input, shape index: {}]   ;;  %s1590_s7 = inlined_call_operand.vmem [shape: f32[64,10], index: 7, kind: input, shape index: {}]   ;;  %s1591_s8 = inlined_call_operand.vmem [shape: f32[1,10], index: 8, kind: input, shape index: {}]   ;;  %s1592_s9 = inlined_call_operand.hbm [shape: f32[8,10], index: 9, kind: output, shape index: {}]  }
   0x1   :  { %v1161_v0 = vld [vmem:[%s1584_s1 + $0x40] sm:$0xff]   ;;  %v1165_v4 = vld [vmem:[%s1584_s1 + $0x48] sm:$0xff]   ;;  %v1169_v8 = vld [vmem:[%s1584_s1 + $0x50] sm:$0xff]  }
   0x2   :  { %v1162_v1 = vld [vmem:[%s1584_s1] sm:$0xff]   ;;  %963 = vmatprep.subr.bf16.mxu0 %v1161_v0  ;;  %v1166_v5 = vld [vmem:[%s1584_s1 + $0x8] sm:$0xff]   ;;  %v1170_v9 = vld [vmem:[%s1584_s1 + $0x10] sm:$0xff]  }
   0x3   :  { %v1163_v2 = vld [vmem:[%s1584_s1 + $0xc0] sm:$0xff]   ;;  %964 = vmatpush3.bf16.msra.mxu0 %v1162_v1  ;;  %v1167_v6 = vld [vmem:[%s1584_s1 + $0xc8] sm:$0xff]   ;;  %v1171_v10 = vld [vmem:[%s1584_s1 + $0xd0] sm:$0xff]  }
   0x4   :  { %v1164_v3 = vld [vmem:[%s1584_s1 + $0x80] sm:$0xff]   ;;  %985 = vmatprep.subr.bf16.mxu1 %v1163_v2  ;;  %965 = vmatprep.subr.bf16.mxu0 %v1165_v4  ;;  %v1168_v7 = vld [vmem:[%s1584_s1 + $0x88] sm:$0xff]   ;;  %v1172_v11 = vld [vmem:[%s1584_s1 + $0x90] sm:$0xff]  }
   0x5   :  { %986 = vmatpush3.bf16.msra.mxu1 %v1164_v3  ;;  %v1173_v12 = vld [vmem:[%s1584_s1 + $0x58] sm:$0xff]   ;;  %v1177_v16 = vld [vmem:[%s1584_s1 + $0x60] sm:$0xff]   ;;  %v1181_v20 = vld [vmem:[%s1584_s1 + $0x68] sm:$0xff]  }
   0x6   :  { %987 = vmatprep.subr.bf16.mxu1 %v1167_v6  ;;  %v1174_v13 = vld [vmem:[%s1584_s1 + $0x18] sm:$0xff]   ;;  %v1178_v17 = vld [vmem:[%s1584_s1 + $0x20] sm:$0xff]   ;;  %v1182_v21 = vld [vmem:[%s1584_s1 + $0x28] sm:$0xff]  }
   0x7   :  { %966 = vmatpush3.bf16.msra.mxu0 %v1166_v5  ;;  %v1175_v14 = vld [vmem:[%s1584_s1 + $0xd8] sm:$0xff]   ;;  %v1179_v18 = vld [vmem:[%s1584_s1 + $0xe0] sm:$0xff]   ;;  %v1183_v22 = vld [vmem:[%s1584_s1 + $0xe8] sm:$0xff]  }
   0x8   :  { %967 = vmatprep.subr.bf16.mxu0 %v1169_v8  ;;  %v1176_v15 = vld [vmem:[%s1584_s1 + $0x98] sm:$0xff]   ;;  %v1180_v19 = vld [vmem:[%s1584_s1 + $0xa0] sm:$0xff]   ;;  %v1184_v23 = vld [vmem:[%s1584_s1 + $0xa8] sm:$0xff]  }
   0x9   :  { %988 = vmatpush3.bf16.msra.mxu1 %v1168_v7  ;;  %v1185_v24 = vld [vmem:[%s1584_s1 + $0x70] sm:$0xff]   ;;  %v1189_v28 = vld [vmem:[%s1584_s1 + $0x78] sm:$0xff]   ;;  %v35_v31 = vld [vmem:[%s1583_s0 + $0x8] sm:$0xff] }
   0xa   :  { %989 = vmatprep.subr.bf16.mxu1 %v1171_v10  ;;  %v1186_v25 = vld [vmem:[%s1584_s1 + $0x30] sm:$0xff]   ;;  %v1190_v29 = vld [vmem:[%s1584_s1 + $0x38] sm:$0xff]   ;;  %v42_v32 = vpack.c.bf16 %v35_v31, %v35_v31  ;;  %v34_v34 = vld [vmem:[%s1583_s0] sm:$0xff] }
   0xb   :  { %968 = vmatpush3.bf16.msra.mxu0 %v1170_v9  ;;  %v1187_v26 = vld [vmem:[%s1584_s1 + $0xf0] sm:$0xff]   ;;  %v1191_v30 = vld [vmem:[%s1584_s1 + $0xf8] sm:$0xff]   ;;  %v41_v35 = vpack.c.bf16 %v34_v34, %v34_v34  ;;  %v1193_v36 = vld [vmem:[%s1584_s1 + $0x140] sm:$0xff]  }
   0xc   :  { %969 = vmatprep.subr.bf16.mxu0 %v1173_v12  ;;  %v1188_v27 = vld [vmem:[%s1584_s1 + $0xb0] sm:$0xff]   ;;  %v1192_v33 = vld [vmem:[%s1584_s1 + $0xb8] sm:$0xff]   ;;  %483 = vmatprep.mubr.bf16.mxu0 %v42_v32  ;;  %v1194_v39 = vld [vmem:[%s1584_s1 + $0x100] sm:$0xff]  }
   0xd   :  { %990 = vmatpush3.bf16.msra.mxu1 %v1172_v11  ;;  %v37_v37 = vld [vmem:[%s1583_s0 + $0x18] sm:$0xff]  ;;  %v36_v40 = vld [vmem:[%s1583_s0 + $0x10] sm:$0xff]  ;;  %v1195_v42 = vld [vmem:[%s1584_s1 + $0x148] sm:$0xff]  }
   0xe   :  { %991 = vmatprep.subr.bf16.mxu1 %v1175_v14  ;;  %v44_v38 = vpack.c.bf16 %v37_v37, %v37_v37  ;;  %v43_v41 = vpack.c.bf16 %v36_v40, %v36_v40  ;;  %v1196_v43 = vld [vmem:[%s1584_s1 + $0x108] sm:$0xff]   ;;  %v1197_v45 = vld [vmem:[%s1584_s1 + $0x150] sm:$0xff]   ;;  %v1199_v47 = vld [vmem:[%s1584_s1 + $0x158] sm:$0xff]  }
   0xf   :  { %970 = vmatpush3.bf16.msra.mxu0 %v1174_v13  ;;  %v1198_v46 = vld [vmem:[%s1584_s1 + $0x110] sm:$0xff]   ;;  %v1200_v48 = vld [vmem:[%s1584_s1 + $0x118] sm:$0xff]   ;;  %v1201_v49 = vld [vmem:[%s1584_s1 + $0x160] sm:$0xff]  }
  0x10   :  { %971 = vmatprep.subr.bf16.mxu0 %v1177_v16  ;;  %523 = vmatprep.mubr.bf16.mxu1 %v44_v38  ;;  %v1202_v50 = vld [vmem:[%s1584_s1 + $0x120] sm:$0xff]   ;;  %v1203_v51 = vld [vmem:[%s1584_s1 + $0x168] sm:$0xff]   ;;  %v40_v55 = vld [vmem:[%s1583_s0 + $0x30] sm:$0xff] }
  0x11   :  { %992 = vmatpush3.bf16.msra.mxu1 %v1176_v15  ;;  %v1209_v52 = vld [vmem:[%s1584_s1 + $0x180] sm:$0xff]   ;;  %v39_v53 = vld [vmem:[%s1583_s0 + $0x28] sm:$0xff] }
  0x12   :  { %993 = vmatprep.subr.bf16.mxu1 %v1179_v18  ;;  %v46_v54 = vpack.c.bf16 %v39_v53, %v39_v53 }
  0x13   :  { %972 = vmatpush3.bf16.msra.mxu0 %v1178_v17 }
  0x14   :  { %973 = vmatprep.subr.bf16.mxu0 %v1181_v20 }
  0x15   :  { %994 = vmatpush3.bf16.msra.mxu1 %v1180_v19 }
  0x16   :  { %995 = vmatprep.subr.bf16.mxu1 %v1183_v22 }
  0x17   :  { %974 = vmatpush3.bf16.msra.mxu0 %v1182_v21 }
  0x18   :  { %975 = vmatprep.subr.bf16.mxu0 %v1185_v24 }
  0x19   :  { %996 = vmatpush3.bf16.msra.mxu1 %v1184_v23 }
  0x1a   :  { %997 = vmatprep.subr.bf16.mxu1 %v1187_v26 }
  0x1b   :  { %976 = vmatpush3.bf16.msra.mxu0 %v1186_v25 }
  0x1c   :  { %977 = vmatprep.subr.bf16.mxu0 %v1189_v28 }
  0x1d   :  { %998 = vmatpush3.bf16.msra.mxu1 %v1188_v27 }
  0x1e   :  { %999 = vmatprep.subr.bf16.mxu1 %v1191_v30 }
  0x1f   :  { %978 = vmatpush3.bf16.msra.mxu0 %v1190_v29 }
  0x20   :  { %1007 = vmatprep.subr.bf16.mxu0 %v1193_v36 }
  0x21   :  { %1000 = vmatpush3.bf16.msra.mxu1 %v1192_v33 }
  0x22   :  { %484 = vmatmul.mubr.bf16.vlgmr.msra.gmra.mrb[0].mxu0 %v41_v35  ;;  %1058 = vmatprep.subr.bf16.mxu1 %v1238_v44 }
  0x23   :  { %1008 = vmatpush3.bf16.msra.mxu0 %v1194_v39 }
  0x24   :  { %524 = vmatmul.mubr.bf16.vlgmr.msra.gmra.mrb[0].mxu1 %v43_v41  ;;  %1009 = vmatprep.subr.bf16.mxu0 %v1195_v42 }
  0x25   :  { %1060 = vmatprep.mubr.msk.bf16.mxu1 %vm1239_vm0, %v1238_v44 }
  0x27   :  { %1010 = vmatpush3.bf16.msra.mxu0 %v1196_v43 }
  0x28   :  { %1011 = vmatprep.subr.bf16.mxu0 %v1197_v45 }
  0x2b   :  { %1012 = vmatpush3.bf16.msra.mxu0 %v1198_v46 }
  0x2c   :  { %1013 = vmatprep.subr.bf16.mxu0 %v1199_v47 }
  0x2f   :  { %1014 = vmatpush3.bf16.msra.mxu0 %v1200_v48 }
  0x30   :  { %1015 = vmatprep.subr.bf16.mxu0 %v1201_v49 }
  0x31   :  { %14 = vsyncpa [#allocation3], 0  ;;  %v1204_v56 = vld [vmem:[%s1584_s1 + $0x128] sm:$0xff]   ;;  %1059 = vmatpush3.bf16.msra.mxu1 %v1209_v52  ;;  %v47_v57 = vpack.c.bf16 %v40_v55, %v40_v55  ;;  %vm447_vm1 = vcmask 130048   ;;  %v1205_v58 = vld [vmem:[%s1584_s1 + $0x170] sm:$0xff]   ;;  %563 = vmatprep.mubr.bf16.mxu0 %v46_v54  ;;  %v1240_v3 = vmov 0.0|0.0  }
  0x32   :  { %v1206_v59 = vld [vmem:[%s1584_s1 + $0x130] sm:$0xff]   ;;  %v1207_v60 = vld [vmem:[%s1584_s1 + $0x178] sm:$0xff]   ;;  %v38_v62 = vld [vmem:[%s1583_s0 + $0x20] sm:$0xff]  ;;  %1121 = vmatprep.subr.bf16.mxu1 %v1240_v3  ;;  %vm627_vm2 = vcmask 523264   ;;  %vm879_vm3 = vcmask 80896  }
  0x33   :  { %1016 = vmatpush3.bf16.msra.mxu0 %v1202_v50  ;;  %v1208_v61 = vld [vmem:[%s1584_s1 + $0x138] sm:$0xff]   ;;  %v45_v63 = vpack.c.bf16 %v38_v62, %v38_v62  ;;  %v612_v0 = vld [vmem:[%s1586_s3] sm:$0xff]  ;;  %v613_v1 = vld [vmem:[%s1586_s3 + $0x8] sm:$0xff] }
  0x34   :  { %1017 = vmatprep.subr.bf16.mxu0 %v1203_v51  ;;  %1061 = vmatmul.mubr.msk.bf16.vlgmr.msra.gmra.mrb[4].mxu1 %vm447_vm1, %v47_v57  ;;  %v614_v2 = vld [vmem:[%s1586_s3 + $0x10] sm:$0xff]  ;;  %v1122_v4 = vpack.c.bf16 %v613_v1, %v612_v0  ;;  %v615_v5 = vld [vmem:[%s1586_s3 + $0x18] sm:$0xff]  ;;  %v616_v7 = vld [vmem:[%s1586_s3 + $0x20] sm:$0xff] }
  0x35   :  { %1080 = vmatprep.mubr.msk.f32.mxu1 %vm1239_vm0, %v1238_v44  ;;  %v1125_v6 = vpack.c.bf16 %v615_v5, %v614_v2  ;;  %v617_v8 = vld [vmem:[%s1586_s3 + $0x28] sm:$0xff]  ;;  %v618_v10 = vld [vmem:[%s1586_s3 + $0x30] sm:$0xff]  ;;  %v619_v11 = vld [vmem:[%s1586_s3 + $0x38] sm:$0xff] }
  0x36   :  { %1123 = vmatpush3.bf16.msra.mxu1 %v1122_v4  ;;  %v1128_v9 = vpack.c.bf16 %v617_v8, %v616_v7  ;;  %v1131_v12 = vpack.c.bf16 %v619_v11, %v618_v10  ;;  %v906_v14 = vld [vmem:[%s1585_s2] ss:$0 sm:$0xff]  ;;  %v703_v37 = vld [vmem:[%s1588_s5 + $0x8] sm:$0xff]  ;;  %v704_v41 = vld [vmem:[%s1588_s5 + $0x10] sm:$0xff] }
  0x37   :  { %1018 = vmatpush3.bf16.msra.mxu0 %v1204_v56  ;;  %1124 = vmatprep.subr.bf16.mxu1 %v1240_v3  ;;  %v702_v36 = vld [vmem:[%s1588_s5] sm:$0xff]  ;;  %v705_v42 = vld [vmem:[%s1588_s5 + $0x18] sm:$0xff]  ;;  %v707_v46 = vld [vmem:[%s1588_s5 + $0x28] sm:$0xff] }
  0x38   :  { %1019 = vmatprep.subr.bf16.mxu0 %v1205_v58  ;;  %v1134_v39 = vpack.c.bf16 %v703_v37, %v702_v36  ;;  %v1137_v43 = vpack.c.bf16 %v705_v42, %v704_v41  ;;  %v706_v45 = vld [vmem:[%s1588_s5 + $0x20] sm:$0xff]  ;;  %v709_v48 = vld [vmem:[%s1588_s5 + $0x38] sm:$0xff]  ;;  %v792_v51 = vld [vmem:[%s1590_s7 + $0x8] sm:$0xff] }
  0x39   :  { %v1140_v47 = vpack.c.bf16 %v707_v46, %v706_v45  ;;  %v791_v50 = vld [vmem:[%s1590_s7] sm:$0xff]  ;;  %v793_v52 = vld [vmem:[%s1590_s7 + $0x10] sm:$0xff]  ;;  %v794_v54 = vld [vmem:[%s1590_s7 + $0x18] sm:$0xff] }
  0x3a   :  { %1126 = vmatpush3.bf16.msra.mxu1 %v1125_v6  ;;  %v1146_v53 = vpack.c.bf16 %v792_v51, %v791_v50  ;;  %v1149_v55 = vpack.c.bf16 %v794_v54, %v793_v52  ;;  %v795_v56 = vld [vmem:[%s1590_s7 + $0x20] sm:$0xff]  ;;  %v796_v57 = vld [vmem:[%s1590_s7 + $0x28] sm:$0xff]  ;;  %v797_v0 = vld [vmem:[%s1590_s7 + $0x30] sm:$0xff] }
  0x3b   :  { %1020 = vmatpush3.bf16.msra.mxu0 %v1206_v59  ;;  %1127 = vmatprep.subr.bf16.mxu1 %v1240_v3  ;;  %v1152_v58 = vpack.c.bf16 %v796_v57, %v795_v56  ;;  %v957_v59 = vld [vmem:[%s1587_s4] ss:$0 sm:$0xff]  ;;  %v798_v1 = vld [vmem:[%s1590_s7 + $0x38] sm:$0xff] }
  0x3c   :  { %1021 = vmatprep.subr.bf16.mxu0 %v1207_v60  ;;  %v1155_v2 = vpack.c.bf16 %v798_v1, %v797_v0  ;;  %v961_v8 = vld [vmem:[%s1591_s8] ss:$0 sm:$0xff] }
  0x3e   :  { %1129 = vmatpush3.bf16.msra.mxu1 %v1128_v9 }
  0x3f   :  { %1022 = vmatpush3.bf16.msra.mxu0 %v1208_v61  ;;  %1130 = vmatprep.subr.bf16.mxu1 %v1240_v3 }
  0x40   :  { %1145 = vmatprep.subr.bf16.mxu0 %v1240_v3 }
  0x42   :  { %564 = vmatmul.mubr.bf16.vlgmr.msra.gmra.mrb[4].mxu0 %v45_v63  ;;  %1132 = vmatpush3.bf16.msra.mxu1 %v1131_v12 }
  0x43   :  { %1118 = vmatprep.mubr.msk.f32.mxu0 %vm1239_vm0, %v1238_v44  ;;  %1133 = vmatprep.subr.bf16.mxu1 %v1240_v3 }
  0x44   :  { %1147 = vmatpush3.bf16.msra.mxu0 %v1146_v53 }
  0x45   :  { %1148 = vmatprep.subr.bf16.mxu0 %v1240_v3 }
  0x48   :  { %1150 = vmatpush3.bf16.msra.mxu0 %v1149_v55 }
  0x49   :  { %1151 = vmatprep.subr.bf16.mxu0 %v1240_v3 }
  0x4c   :  { %1153 = vmatpush3.bf16.msra.mxu0 %v1152_v58 }
  0x4d   :  { %1154 = vmatprep.subr.bf16.mxu0 %v1240_v3 }
  0x50   :  { %1156 = vmatpush3.bf16.msra.mxu0 %v1155_v2 }
  0xf5   :  { %v979_v13 = vpop.f32.mrb[0].mxu0 }
  0xf6   :  { %v980_v15 = vpop.f32.mrb[1].mxu0 }
  0xf7   :  { %v981_v16 = vadd.f32 %v980_v15, %v979_v13  ;;  %v982_v17 = vpop.f32.mrb[2].mxu0  ;;  %v1001_v18 = vpop.f32.mrb[0].mxu1 }
  0xf8   :  { %v983_v19 = vpop.f32.mrb[3].mxu0  ;;  %v1002_v21 = vpop.f32.mrb[1].mxu1 }
  0xf9   :  { %v486_v20 = vadd.f32 %v981_v16, %v906_v14  ;;  %v1003_v22 = vadd.f32 %v1002_v21, %v1001_v18  ;;  %v1004_v23 = vpop.f32.mrb[2].mxu1 }
  0xfa   :  { %v1005_v24 = vpop.f32.mrb[3].mxu1 }
  0xfb   :  { %v526_v25 = vadd.f32 %v1003_v22, %v486_v20 }
 0x107   :  { %v605_v26 = vpop.f32.mrb[4].mxu1 }
 0x108   :  { %v1062_v27 = vpop.f32.mrb[5].mxu1 }
 0x109   :  { %v608_v28 = vpop.f32.mrb[6].mxu1 }
 0x10a   :  { %v1063_v29 = vpop.f32.mrb[7].mxu1 }
 0x115   :  { %v1023_v30 = vpop.f32.mrb[4].mxu0 }
 0x116   :  { %v1024_v31 = vpop.f32.mrb[5].mxu0 }
 0x117   :  { %v1025_v32 = vadd.f32 %v1024_v31, %v1023_v30  ;;  %v1026_v33 = vpop.f32.mrb[6].mxu0 }
 0x118   :  { %v1027_v34 = vpop.f32.mrb[7].mxu0 }
 0x119   :  { %v566_v35 = vadd.f32 %v1025_v32, %v526_v25 }
 0x11b   :  { %v606_v38 = vadd.f32 %v605_v26, %v566_v35 }
 0x11d   :  { %v611_v40 = vmax.f32 %v606_v38, 0.0 }
 0x11f   :  { %1081 = vmatmul.mubr.msk.f32.vlgmr.msra.gmra.mrb[8].mxu1 %vm627_vm2, %v611_v40 }
 0x120   :  { %1135 = vmatpush3.bf16.msra.mxu1 %v1134_v39  ;;  %1099 = vmatprep.mubr.msk.f32.mxu1 %vm1239_vm0, %v1238_v44  ;;  %v708_v44 = vld [vmem:[%s1588_s5 + $0x30] sm:$0xff] }
 0x121   :  { %1136 = vmatprep.subr.bf16.mxu1 %v1240_v3  ;;  %v1143_v49 = vpack.c.bf16 %v709_v48, %v708_v44 }
 0x124   :  { %1138 = vmatpush3.bf16.msra.mxu1 %v1137_v43 }
 0x125   :  { %1139 = vmatprep.subr.bf16.mxu1 %v1240_v3 }
 0x128   :  { %1141 = vmatpush3.bf16.msra.mxu1 %v1140_v47 }
 0x129   :  { %1142 = vmatprep.subr.bf16.mxu1 %v1240_v3  ;;  %v959_v3 = vld [vmem:[%s1589_s6] ss:$0 sm:$0xff]  ;;  %s1241_s6 = smov [#allocation2]  }
 0x12a   :  { %s898_s7 = sshll.u32 %s1241_s6, 4  ;;  %s899_s7 = int_to_ptr.vmem [resolvable:$true] %s898_s7 }
 0x12b   :  { %s1214_s8 = scalar_lea.vmem %s899_s7, 128  ;;  %p1219_p1 = scmp.lt.s32.totalorder %s899_s7, %s899_s7 }
 0x12c   :  { %1144 = vmatpush3.bf16.msra.mxu1 %v1143_v49  ;;  %p1215_p0 = scmp.ne.s32.totalorder %s899_s7, %s1214_s8  ;;  %p1220_p2 = scmp.lt.s32.totalorder %s1214_s8, %s1214_s8 }
 0x12e   :  { %p1221_p3 = por %p1220_p2, %p1219_p1 }
 0x130   :  { %p1222_p4 = pnand %p1221_p3, %p1215_p0 }
 0x1f2   :  { %v697_v60 = vpop.f32.mrb[8].mxu1 }
 0x1f3   :  { %v698_v61 = vadd.f32 %v957_v59, %v697_v60  ;;  %v1082_v62 = vpop.f32.mrb[9].mxu1 }
 0x1f5   :  { %v701_v63 = vmax.f32 %v698_v61, 0.0 }
 0x1f7   :  { %1100 = vmatmul.mubr.msk.f32.vlgmr.msra.gmra.mrb[10].mxu1 %vm627_vm2, %v701_v63 }
 0x2ca   :  { %v786_v4 = vpop.f32.mrb[10].mxu1 }
 0x2cb   :  { %v787_v5 = vadd.f32 %v959_v3, %v786_v4  ;;  %v1101_v6 = vpop.f32.mrb[11].mxu1 }
 0x2cd   :  { %v790_v7 = vmax.f32 %v787_v5, 0.0 }
 0x2cf   :  { %1119 = vmatmul.mubr.msk.f32.vlgmr.msra.gmra.mrb[8].mxu0 %vm627_vm2, %v790_v7 }
 0x3a2   :  { %v875_v9 = vpop.f32.mrb[8].mxu0 }
 0x3a3   :  { %v876_v10 = vadd.f32 %v961_v8, %v875_v9  ;;  %v1120_v11 = vpop.f32.mrb[9].mxu0 }
 0x3a5   :  { %v880_v12 = vsel %vm879_vm3, %v876_v10, -inf }
 0x3a6   :  { %881 = vmax.xlane.f32.xlu0 %v880_v12 }
 0x433   :  { %v882_v13 = vpop.xlane.xlu0 %881 }
 0x434   :  { %v883_v14 = vsub.f32 %v876_v10, %v882_v13 }
 0x436   :  { %v884_v15 = vmul.f32 1.442695, %v883_v14 }
 0x438   :  { %1210 = vpow2.f32 %v884_v15 }
 0x442   :  { %v1211_v16 = vpop.eup %1210 }
 0x443   :  { %v886_v17 = vsel %vm879_vm3, %v1211_v16, 0.0 }
 0x444   :  { %887 = vadd.xlane.f32.xlu0 %v886_v17 }
 0x4d1   :  { %v888_v18 = vpop.xlane.xlu0 %887 }
 0x4d2   :  { %1212 = vrcp.f32 %v888_v18 }
 0x4dc   :  { %v1213_v19 = vpop.eup %1212 }
 0x4dd   :  { %v890_v20 = vmul.f32 %v1213_v19, %v1211_v16 }
 0x4df   :  { %891 = vst.msk [vmem:[#allocation2] sm:$0xff] %vm879_vm3, %v890_v20 }
 0x4e0   :  { %1225 = shalt.err (!%p1222_p4)
}
 0x4e1   :  { %s1226_s0 = scalar_lea.hbm %s1592_s9, 128 }
 0x4e2   :  { %p1227_p5 = scmp.ne.s32.totalorder %s1592_s9, %s1226_s0  ;;  %p1230_p6 = scmp.lt.u32.totalorder %s1226_s0, %s1592_s9 }
 0x4e4   :  { %p1232_p7 = pnand %p1230_p6, %p1227_p5 }
 0x4e6   :  { %1235 = shalt.err (!%p1232_p7)
}
 0x4e7   :  { %901 = dma.vmem_to_hbm [thread:$0]  %s899_s7, 128, %s1592_s9, [#allocation3]  }
 0x4e8   :  { %1236 = dma.done.wait [#allocation3], 128  }
 0x4e9   :  { %1237 = vsyncadd [#allocation3], 4294967168 }
 0x4ea   :  { %905 = vsyncpa [#allocation3], 1 }

</bundles_post_ra>
